<compile_context>
chip_gen: v5e
topology: v5e:2x2
jax: 0.10.0
libtpu: 0.0.40
codegen_flags: <defaults>
</compile_context>

<pallas_src>
import jax
import jax.numpy as jnp
from jax.experimental import pallas as pl
from jax.experimental.pallas import tpu as pltpu


LEAKY_SLOPE = 0.1  # matches nn.LeakyReLU(0.1) in the PyTorch module


def ffn_kernel(x_ref, w0_ref, b0_ref, w1_ref, b1_ref, o_ref):
    # Layer 0: linear -> LeakyReLU(0.1).  dropout_p == 0.0 -> identity (omitted).
    h = jnp.dot(x_ref[...], w0_ref[...], preferred_element_type=jnp.float32)
    h = h + b0_ref[0:1, :]                 # (tile_m, 4*d_hidden) + (1, 4*d_hidden)
    h = jnp.maximum(h, LEAKY_SLOPE * h)    # LeakyReLU(0.1): one vmul + vmax, f32 VPU
    # Final layer: linear only (no activation / dropout after the last linear).
    out = jnp.dot(h.astype(w1_ref.dtype), w1_ref[...],
                  preferred_element_type=jnp.float32)
    out = out + b1_ref[0:1, :]
    o_ref[...] = out.astype(o_ref.dtype)
    # TODO(synk): dropout_p > 0 would need pltpu.prng_seed / prng_random_bits; not
    # needed here since dropout_p == 0.0 (identity, incl. eval mode).


def _round_up(x, m):
    return ((x + m - 1) // m) * m


def _sublane(dtype):
    # Sub-32-bit dtypes pack along sublanes: f32 -> 8, bf16 -> 16, int8/fp8 -> 32.
    return max(8, 32 // jnp.dtype(dtype).itemsize)


def positionwise_feed_forward(x, w0, b0, w1, b1, *, tile_rows=1024):
    """x: (N, d_input); w0: (d_hidden, d_input); b0: (d_hidden,);
    w1: (d_output, d_hidden); b1: (d_output,)."""
    n, d_in = x.shape
    d_hidden = w0.shape[0]
    d_out = w1.shape[0]

    # Lane-packing factor: pack `pack` logical rows into one 128-lane row.
    pack = 128 // d_in if (0 < d_in <= 128 and 128 % d_in == 0) else 1

    # Ragged tail: pad only up to pack-1 (<=3) rows so the packing reshape works.
    rem = n % pack
    if rem:
        x = jnp.pad(x, ((0, pack - rem), (0, 0)))
    n_rows = x.shape[0]
    n_packed = n_rows // pack
    x_packed = x.reshape(n_packed, pack * d_in)        # free: row-major contiguous

    d_in_p, d_hid_p, d_out_p = pack * d_in, pack * d_hidden, pack * d_out

    # Block-diagonal weights: x_packed @ blockdiag(W^T, ..., W^T) applies the same
    # linear layer independently to each of the `pack` packed logical rows.
    eye = jnp.eye(pack, dtype=jnp.float32)
    w0_bd = jnp.kron(eye, w0.T.astype(jnp.float32)).astype(x.dtype)   # (128, 256)
    w1_bd = jnp.kron(eye, w1.T.astype(jnp.float32)).astype(x.dtype)   # (256, 128)
    # Biases tiled along lanes, pre-broadcast to (8, d) f32 slabs (full (8,128) tiles).
    b0_slab = jnp.broadcast_to(jnp.tile(b0.astype(jnp.float32), pack)[None, :],
                               (8, d_hid_p))
    b1_slab = jnp.broadcast_to(jnp.tile(b1.astype(jnp.float32), pack)[None, :],
                               (8, d_out_p))

    # Row-tile choice: large enough to amortize ~0.35us/grid-step overhead, small
    # enough that the grid has >=2 steps (megacore sharding on v7x) when there is
    # enough work.  Rounded to the dtype's sublane packing.
    sub = _sublane(x.dtype)
    if n_packed <= sub:
        tile_m = n_packed                       # single full-extent block (tiny N)
    else:
        tile_m = min(int(tile_rows), _round_up(pl.cdiv(n_packed, 2), sub))
        tile_m = max(sub, (tile_m // sub) * sub)
    grid = (pl.cdiv(n_packed, tile_m),)

    out = pl.pallas_call(
        ffn_kernel,
        out_shape=jax.ShapeDtypeStruct((n_packed, d_out_p), x.dtype),
        grid=grid,
        in_specs=[
            # x: tiled over packed rows; lane dim is the full 128-wide extent.
            pl.BlockSpec((tile_m, d_in_p), lambda i: (i, 0)),
            # Weights / biases: constant index_map -> resident, not re-DMA'd per step.
            pl.BlockSpec((d_in_p, d_hid_p), lambda i: (0, 0)),
            pl.BlockSpec((8, d_hid_p), lambda i: (0, 0)),
            pl.BlockSpec((d_hid_p, d_out_p), lambda i: (0, 0)),
            pl.BlockSpec((8, d_out_p), lambda i: (0, 0)),
        ],
        out_specs=pl.BlockSpec((tile_m, d_out_p), lambda i: (i, 0)),
        compiler_params=pltpu.CompilerParams(
            # Row tiles are fully independent -> megacore sharding on v7x; the grid
            # is kept at >=2 steps when possible so both TensorCores get work.
            dimension_semantics=("parallel",)),
    )(x_packed, w0_bd, b0_slab, w1_bd, b1_slab)

    out = out.reshape(n_rows, d_out)               # free: row-major contiguous
    return out[:n] if n_rows != n else out


def _init_linear(key, d_in, d_out):
    """Deterministic init mirroring nn.Linear: U(-1/sqrt(d_in), 1/sqrt(d_in))."""
    kw, kb = jax.random.split(key)
    bound = 1.0 / jnp.sqrt(jnp.float32(d_in))
    w = jax.random.uniform(kw, (d_out, d_in), jnp.float32, -bound, bound)
    b = jax.random.uniform(kb, (d_out,), jnp.float32, -bound, bound)
    return w, b


def _reference(x, w0, b0, w1, b1):
    h = x @ w0.T + b0
    h = jnp.where(h > 0, h, LEAKY_SLOPE * h)
    return h @ w1.T + b1


if __name__ == "__main__":
    d_input, d_hidden, d_output = 32, 64, 32

    key = jax.random.PRNGKey(0)
    kx, k0, k1, kx2, kx3 = jax.random.split(key, 5)

    w0, b0 = _init_linear(k0, d_input, d_hidden)
    w1, b1 = _init_linear(k1, d_hidden, d_output)

    # Case 1: tiny batch (4 packed rows -> single full-extent block).
    x_small = jax.random.normal(kx, (16, d_input), jnp.float32)
    out_small = jax.block_until_ready(
        positionwise_feed_forward(x_small, w0, b0, w1, b1))
    ref_small = _reference(x_small, w0, b0, w1, b1)
    assert out_small.shape == (16, d_output)
    assert jnp.allclose(out_small, ref_small, atol=1e-4, rtol=1e-4), \
        "mismatch vs reference (small)"

    # Case 2: multi-tile path (N=200 -> 50 packed rows -> tile_m=32, grid=(2,) with a
    # partial boundary block masked by Pallas; no whole-array pad/slice).
    x_big = jax.random.normal(kx2, (200, d_input), jnp.float32)
    out_big = jax.block_until_ready(
        positionwise_feed_forward(x_big, w0, b0, w1, b1))
    ref_big = _reference(x_big, w0, b0, w1, b1)
    assert out_big.shape == (200, d_output)
    assert jnp.allclose(out_big, ref_big, atol=1e-4, rtol=1e-4), \
        "mismatch vs reference (tiled + partial boundary block)"

    # Case 3: N not divisible by the packing factor (N=203 -> 1-row tail pad only).
    x_rag = jax.random.normal(kx3, (203, d_input), jnp.float32)
    out_rag = jax.block_until_ready(
        positionwise_feed_forward(x_rag, w0, b0, w1, b1))
    ref_rag = _reference(x_rag, w0, b0, w1, b1)
    assert out_rag.shape == (203, d_output)
    assert jnp.allclose(out_rag, ref_rag, atol=1e-4, rtol=1e-4), \
        "mismatch vs reference (ragged packing tail)"

    print("KERNEL_OK")
</pallas_src>

<mosaic_0001>
module attributes {stable_mosaic.version = 11 : i64} {
  func.func @ffn_kernel(%arg0: i32, %arg1: memref<4x128xf32, #tpu.memory_space<vmem>>, %arg2: memref<128x256xf32, #tpu.memory_space<vmem>>, %arg3: memref<8x256xf32, #tpu.memory_space<vmem>>, %arg4: memref<256x128xf32, #tpu.memory_space<vmem>>, %arg5: memref<8x128xf32, #tpu.memory_space<vmem>>, %arg6: memref<4x128xf32, #tpu.memory_space<vmem>>) attributes {dimension_semantics = [#tpu.dimension_semantics<parallel>], iteration_bounds = array<i64: 1>, scalar_prefetch = 0 : i64, scratch_operands = 0 : i64, tpu.core_type = #tpu.core_type<tc>, window_params = [{transform_indices = @transform_0, window_bounds = array<i64: 4, 128>}, {pipeline_mode = #tpu.pipeline_mode<synchronous>, transform_indices = @transform_1, window_bounds = array<i64: 128, 256>}, {pipeline_mode = #tpu.pipeline_mode<synchronous>, transform_indices = @transform_2, window_bounds = array<i64: 8, 256>}, {pipeline_mode = #tpu.pipeline_mode<synchronous>, transform_indices = @transform_3, window_bounds = array<i64: 256, 128>}, {pipeline_mode = #tpu.pipeline_mode<synchronous>, transform_indices = @transform_4, window_bounds = array<i64: 8, 128>}, {transform_indices = @transform_5, window_bounds = array<i64: 4, 128>}]} {
    %c0 = arith.constant 0 : index
    %c0_0 = arith.constant 0 : index
    %0 = vector.load %arg1[%c0, %c0_0] : memref<4x128xf32, #tpu.memory_space<vmem>>, vector<4x128xf32>
    %c0_1 = arith.constant 0 : index
    %c0_2 = arith.constant 0 : index
    %1 = vector.load %arg2[%c0_1, %c0_2] : memref<128x256xf32, #tpu.memory_space<vmem>>, vector<128x256xf32>
    %cst = arith.constant dense<0.000000e+00> : vector<4x256xf32>
    %2 = tpu.matmul %0, %1, %cst {dimension_numbers = #tpu.dot_dimension_numbers<[1], [0], [0], [1], [0, 0, 1, 1], [], []>} : vector<4x128xf32>, vector<128x256xf32>, vector<4x256xf32> -> vector<4x256xf32>
    %c0_3 = arith.constant 0 : index
    %c0_4 = arith.constant 0 : index
    %3 = vector.load %arg3[%c0_3, %c0_4] : memref<8x256xf32, #tpu.memory_space<vmem>>, vector<1x256xf32>
    %4 = vector.broadcast %3 : vector<1x256xf32> to vector<4x256xf32>
    %5 = arith.addf %2, %4 : vector<4x256xf32>
    %cst_5 = arith.constant 1.000000e-01 : f32
    %6 = vector.broadcast %cst_5 : f32 to vector<4x256xf32>
    %7 = arith.mulf %6, %5 : vector<4x256xf32>
    %8 = arith.maximumf %5, %7 : vector<4x256xf32>
    %c0_6 = arith.constant 0 : index
    %c0_7 = arith.constant 0 : index
    %9 = vector.load %arg4[%c0_6, %c0_7] : memref<256x128xf32, #tpu.memory_space<vmem>>, vector<256x128xf32>
    %cst_8 = arith.constant dense<0.000000e+00> : vector<4x128xf32>
    %10 = tpu.matmul %8, %9, %cst_8 {dimension_numbers = #tpu.dot_dimension_numbers<[1], [0], [0], [1], [0, 0, 1, 1], [], []>} : vector<4x256xf32>, vector<256x128xf32>, vector<4x128xf32> -> vector<4x128xf32>
    %c0_9 = arith.constant 0 : index
    %c0_10 = arith.constant 0 : index
    %11 = vector.load %arg5[%c0_9, %c0_10] : memref<8x128xf32, #tpu.memory_space<vmem>>, vector<1x128xf32>
    %12 = vector.broadcast %11 : vector<1x128xf32> to vector<4x128xf32>
    %13 = arith.addf %10, %12 : vector<4x128xf32>
    %c0_11 = arith.constant 0 : index
    %c0_12 = arith.constant 0 : index
    %14 = vector.load %arg6[%c0_11, %c0_12] : memref<4x128xf32, #tpu.memory_space<vmem>>, vector<4x128xf32>
    tpu.vector_store %arg6[%c0_11, %c0_12], %13 {strides = array<i32>} : memref<4x128xf32, #tpu.memory_space<vmem>>, vector<4x128xf32>,
    return
  }
  func.func @transform_0(%arg0: i32) -> (i32, i32) {
    %c0_i32 = arith.constant 0 : i32
    %c0_i32_0 = arith.constant 0 : i32
    return %arg0, %c0_i32 : i32, i32
  }
  func.func @transform_1(%arg0: i32) -> (i32, i32) {
    %c0_i32 = arith.constant 0 : i32
    %c0_i32_0 = arith.constant 0 : i32
    %c0_i32_1 = arith.constant 0 : i32
    return %c0_i32, %c0_i32_0 : i32, i32
  }
  func.func @transform_2(%arg0: i32) -> (i32, i32) {
    %c0_i32 = arith.constant 0 : i32
    %c0_i32_0 = arith.constant 0 : i32
    %c0_i32_1 = arith.constant 0 : i32
    return %c0_i32, %c0_i32_0 : i32, i32
  }
  func.func @transform_3(%arg0: i32) -> (i32, i32) {
    %c0_i32 = arith.constant 0 : i32
    %c0_i32_0 = arith.constant 0 : i32
    %c0_i32_1 = arith.constant 0 : i32
    return %c0_i32, %c0_i32_0 : i32, i32
  }
  func.func @transform_4(%arg0: i32) -> (i32, i32) {
    %c0_i32 = arith.constant 0 : i32
    %c0_i32_0 = arith.constant 0 : i32
    %c0_i32_1 = arith.constant 0 : i32
    return %c0_i32, %c0_i32_0 : i32, i32
  }
  func.func @transform_5(%arg0: i32) -> (i32, i32) {
    %c0_i32 = arith.constant 0 : i32
    %c0_i32_0 = arith.constant 0 : i32
    return %arg0, %c0_i32 : i32, i32
  }
}

</mosaic_0001>

<bundles_post_ra>
// kernel: tpu_custom_call.1
= control target key start
LH: loop header
LB: loop body
LE: loop exit
PB: predicated region body
PF: predicated region fallthrough
CT: control target
= control target key end

     0   :  { %10 = vsyncpa [#allocation3], 0  ;;  %s491_s0 = inlined_call_operand.hbm [shape: f32[4,128], index: 0, kind: input, shape index: {}]   ;;  %s492_s1 = inlined_call_operand.hbm [shape: f32[128,256], index: 1, kind: input, shape index: {}]   ;;  %s493_s2 = inlined_call_operand.hbm [shape: f32[8,256], index: 2, kind: input, shape index: {}]   ;;  %s494_s3 = inlined_call_operand.hbm [shape: f32[256,128], index: 3, kind: input, shape index: {}]   ;;  %s495_s4 = inlined_call_operand.hbm [shape: f32[8,128], index: 4, kind: input, shape index: {}]   ;;  %s496_s5 = inlined_call_operand.hbm [shape: f32[4,128], index: 5, kind: output, shape index: {}]  }
   0x1   :  { %11 = vsyncpa [#allocation6], 0 }
   0x2   :  { %12 = vsyncpa [#allocation9], 0  ;;  %s29_s20 = sshll.u32 %s492_s1, 4  ;;  %s30_s20 = int_to_ptr.hbm [resolvable:$true] %s29_s20 }
   0x3   :  { %13 = vsyncpa [#allocation4], 0  ;;  %s433_s21 = smov [#allocation5]   ;;  %s53_s25 = sshll.u32 %s494_s3, 4  ;;  %s54_s25 = int_to_ptr.hbm [resolvable:$true] %s53_s25 }
   0x4   :  { %s31_s22 = sshll.u32 %s433_s21, 4  ;;  %s434_s26 = smov 256   ;;  %s32_s22 = int_to_ptr.vmem [resolvable:$true] %s31_s22 }
   0x5   :  { %s435_s27 = smov 16   ;;  %s436_s28 = smov [#allocation8]  }
   0x6   :  { %37 = dma.hbm_to_vmem [thread:$0]  %s30_s20, 4096, %s32_s22, [#allocation6], %s434_s26, %s434_s26, %s435_s27  }
   0x7   :  { %s55_s29 = sshll.u32 %s436_s28, 4  ;;  %s437_s30 = smov 128   ;;  %s56_s29 = int_to_ptr.vmem [resolvable:$true] %s55_s29 }
   0x8   :  { %s438_s6 = smov 8   ;;  %s19_s8 = sshll.u32 %s491_s0, 4  ;;  %s20_s8 = int_to_ptr.hbm [resolvable:$true] %s19_s8 }
   0x9   :  { %61 = dma.hbm_to_vmem [thread:$0]  %s54_s25, 4096, %s56_s29, [#allocation9], %s437_s30, %s437_s30, %s438_s6  }
   0xa   :  { %s439_s9 = smov [#allocation2]   ;;  %s43_s12 = sshll.u32 %s493_s2, 4  ;;  %s44_s12 = int_to_ptr.hbm [resolvable:$true] %s43_s12 }
   0xb   :  { %s21_s10 = sshll.u32 %s439_s9, 4  ;;  %s440_s13 = smov [#allocation7]   ;;  %s22_s10 = int_to_ptr.vmem [resolvable:$true] %s21_s10 }
   0xc   :  { %24 = dma.hbm_to_vmem [thread:$0]  %s20_s8, 64, %s22_s10, [#allocation3]  }
   0xd   :  { %s45_s14 = sshll.u32 %s440_s13, 4  ;;  %s67_s17 = sshll.u32 %s495_s4, 4  ;;  %s46_s14 = int_to_ptr.vmem [resolvable:$true] %s45_s14  ;;  %s68_s17 = int_to_ptr.hbm [resolvable:$true] %s67_s17 }
   0xe   :  { %48 = dma.hbm_to_vmem [thread:$0]  %s44_s12, 256, %s46_s14, [#allocation6]  }
   0xf   :  { %s441_s0 = smov [#allocation10]  }
  0x10   :  { %s69_s18 = sshll.u32 %s441_s0, 4  ;;  %s70_s18 = int_to_ptr.vmem [resolvable:$true] %s69_s18 }
  0x11   :  { %72 = dma.hbm_to_vmem [thread:$0]  %s68_s17, 128, %s70_s18, [#allocation9]  }
  0x12   :  { %425 = dma.done.wait [#allocation3], 64  }
  0x13   :  { %426 = vsyncadd [#allocation3], 4294967232 }
  0x14   :  { %427 = dma.done.wait [#allocation6], 4352  }
  0x15   :  { %428 = vsyncadd [#allocation6], 4294962944 }
  0x16   :  { %429 = dma.done.wait [#allocation9], 4224  }
  0x17   :  { %430 = vsyncadd [#allocation9], 4294963072  ;;  %v124_v0 = vld [vmem:[#allocation5 + $0xf0] sm:$0xff]  ;;  %v125_v1 = vld [vmem:[#allocation5 + $0xf8] sm:$0xff]  ;;  %s442_s2 = smov [#allocation11]   ;;  %s258_s21 = sshll.u32 %s496_s5, 4  ;;  %s259_s21 = int_to_ptr.hbm [resolvable:$true] %s258_s21 }
  0x18   :  { %v122_v2 = vld [vmem:[#allocation5 + $0xe0] sm:$0xff]  ;;  %132 = vmatpush.msra.mxu0 %v124_v0  ;;  %152 = vmatpush.msra.mxu1 %v125_v1  ;;  %v123_v3 = vld [vmem:[#allocation5 + $0xe8] sm:$0xff]  ;;  %v120_v4 = vld [vmem:[#allocation5 + $0xd0] sm:$0xff]  ;;  %s256_s4 = sshll.u32 %s442_s2, 4  ;;  %s257_s4 = int_to_ptr.vmem [resolvable:$true] %s256_s4 }
  0x19   :  { %v121_v5 = vld [vmem:[#allocation5 + $0xd8] sm:$0xff]  ;;  %v118_v6 = vld [vmem:[#allocation5 + $0xc0] sm:$0xff]  ;;  %v119_v7 = vld [vmem:[#allocation5 + $0xc8] sm:$0xff] }
  0x1a   :  { %133 = vmatpush.msra.mxu0 %v122_v2  ;;  %153 = vmatpush.msra.mxu1 %v123_v3  ;;  %v116_v8 = vld [vmem:[#allocation5 + $0xb0] sm:$0xff]  ;;  %v117_v9 = vld [vmem:[#allocation5 + $0xb8] sm:$0xff]  ;;  %v114_v10 = vld [vmem:[#allocation5 + $0xa0] sm:$0xff] }
  0x1b   :  { %v115_v11 = vld [vmem:[#allocation5 + $0xa8] sm:$0xff]  ;;  %v112_v12 = vld [vmem:[#allocation5 + $0x90] sm:$0xff]  ;;  %v113_v13 = vld [vmem:[#allocation5 + $0x98] sm:$0xff] }
  0x1c   :  { %134 = vmatpush.msra.mxu0 %v120_v4  ;;  %154 = vmatpush.msra.mxu1 %v121_v5  ;;  %v191_v14 = vld [vmem:[#allocation8 + $0x78] sm:$0xff]  ;;  %v190_v16 = vld [vmem:[#allocation8 + $0x70] sm:$0xff]  ;;  %v189_v20 = vld [vmem:[#allocation8 + $0x68] sm:$0xff] }
  0x1d   :  { %v207_v15 = vld [vmem:[#allocation8 + $0xf8] sm:$0xff]  ;;  %v110_v17 = vld [vmem:[#allocation5 + $0x80] sm:$0xff]  ;;  %210 = vmatpush.msra.mxu2 %v191_v14  ;;  %v205_v21 = vld [vmem:[#allocation8 + $0xe8] sm:$0xff] }
  0x1e   :  { %135 = vmatpush.msra.mxu0 %v118_v6  ;;  %155 = vmatpush.msra.mxu1 %v119_v7  ;;  %v111_v18 = vld [vmem:[#allocation5 + $0x88] sm:$0xff]  ;;  %v206_v19 = vld [vmem:[#allocation8 + $0xf0] sm:$0xff]  ;;  %v108_v22 = vld [vmem:[#allocation5 + $0x70] sm:$0xff] }
  0x1f   :  { %230 = vmatpush.msra.mxu3 %v207_v15  ;;  %v109_v23 = vld [vmem:[#allocation5 + $0x78] sm:$0xff]  ;;  %211 = vmatpush.msra.mxu2 %v190_v16  ;;  %v188_v24 = vld [vmem:[#allocation8 + $0x60] sm:$0xff]  ;;  %v106_v26 = vld [vmem:[#allocation5 + $0x60] sm:$0xff] }
  0x20   :  { %136 = vmatpush.msra.mxu0 %v116_v8  ;;  %156 = vmatpush.msra.mxu1 %v117_v9  ;;  %v204_v25 = vld [vmem:[#allocation8 + $0xe0] sm:$0xff]  ;;  %v107_v27 = vld [vmem:[#allocation5 + $0x68] sm:$0xff]  ;;  %v105_v31 = vld [vmem:[#allocation5 + $0x58] sm:$0xff] }
  0x21   :  { %231 = vmatpush.msra.mxu3 %v206_v19  ;;  %212 = vmatpush.msra.mxu2 %v189_v20  ;;  %v187_v28 = vld [vmem:[#allocation8 + $0x58] sm:$0xff]  ;;  %v104_v30 = vld [vmem:[#allocation5 + $0x50] sm:$0xff]  ;;  %v186_v32 = vld [vmem:[#allocation8 + $0x50] sm:$0xff] }
  0x22   :  { %137 = vmatpush.msra.mxu0 %v114_v10  ;;  %157 = vmatpush.msra.mxu1 %v115_v11  ;;  %v203_v29 = vld [vmem:[#allocation8 + $0xd8] sm:$0xff]  ;;  %v202_v33 = vld [vmem:[#allocation8 + $0xd0] sm:$0xff]  ;;  %v185_v36 = vld [vmem:[#allocation8 + $0x48] sm:$0xff] }
  0x23   :  { %232 = vmatpush.msra.mxu3 %v205_v21  ;;  %213 = vmatpush.msra.mxu2 %v188_v24  ;;  %v102_v34 = vld [vmem:[#allocation5 + $0x40] sm:$0xff]  ;;  %v103_v35 = vld [vmem:[#allocation5 + $0x48] sm:$0xff]  ;;  %v201_v37 = vld [vmem:[#allocation8 + $0xc8] sm:$0xff] }
  0x24   :  { %138 = vmatpush.msra.mxu0 %v112_v12  ;;  %158 = vmatpush.msra.mxu1 %v113_v13  ;;  %v100_v38 = vld [vmem:[#allocation5 + $0x30] sm:$0xff]  ;;  %v101_v39 = vld [vmem:[#allocation5 + $0x38] sm:$0xff]  ;;  %v98_v42 = vld [vmem:[#allocation5 + $0x20] sm:$0xff] }
  0x25   :  { %233 = vmatpush.msra.mxu3 %v204_v25  ;;  %214 = vmatpush.msra.mxu2 %v187_v28  ;;  %v184_v40 = vld [vmem:[#allocation8 + $0x40] sm:$0xff]  ;;  %v99_v43 = vld [vmem:[#allocation5 + $0x28] sm:$0xff]  ;;  %v97_v47 = vld [vmem:[#allocation5 + $0x18] sm:$0xff] }
  0x26   :  { %139 = vmatpush.msra.mxu0 %v110_v17  ;;  %159 = vmatpush.msra.mxu1 %v111_v18  ;;  %v200_v41 = vld [vmem:[#allocation8 + $0xc0] sm:$0xff]  ;;  %v183_v44 = vld [vmem:[#allocation8 + $0x38] sm:$0xff]  ;;  %v182_v48 = vld [vmem:[#allocation8 + $0x30] sm:$0xff] }
  0x27   :  { %234 = vmatpush.msra.mxu3 %v203_v29  ;;  %215 = vmatpush.msra.mxu2 %v186_v32  ;;  %v199_v45 = vld [vmem:[#allocation8 + $0xb8] sm:$0xff]  ;;  %v96_v46 = vld [vmem:[#allocation5 + $0x10] sm:$0xff]  ;;  %v198_v49 = vld [vmem:[#allocation8 + $0xb0] sm:$0xff] }
  0x28   :  { %140 = vmatpush.msra.mxu0 %v108_v22  ;;  %160 = vmatpush.msra.mxu1 %v109_v23  ;;  %v94_v50 = vld [vmem:[#allocation5] sm:$0xff]  ;;  %v95_v51 = vld [vmem:[#allocation5 + $0x8] sm:$0xff]  ;;  %v93_v52 = vld [vmem:[#allocation2] sm:$0xf] }
  0x29   :  { %235 = vmatpush.msra.mxu3 %v202_v33  ;;  %216 = vmatpush.msra.mxu2 %v185_v36  ;;  %v181_v53 = vld [vmem:[#allocation8 + $0x28] sm:$0xff]  ;;  %v180_v55 = vld [vmem:[#allocation8 + $0x20] sm:$0xff]  ;;  %v179_v57 = vld [vmem:[#allocation8 + $0x18] sm:$0xff] }
  0x2a   :  { %141 = vmatpush.msra.mxu0 %v106_v26  ;;  %161 = vmatpush.msra.mxu1 %v107_v27  ;;  %v197_v54 = vld [vmem:[#allocation8 + $0xa8] sm:$0xff]  ;;  %v196_v56 = vld [vmem:[#allocation8 + $0xa0] sm:$0xff]  ;;  %v195_v58 = vld [vmem:[#allocation8 + $0x98] sm:$0xff] }
  0x2b   :  { %236 = vmatpush.msra.mxu3 %v201_v37  ;;  %217 = vmatpush.msra.mxu2 %v184_v40  ;;  %v178_v59 = vld [vmem:[#allocation8 + $0x10] sm:$0xff]  ;;  %v177_v61 = vld [vmem:[#allocation8 + $0x8] sm:$0xff]  ;;  %v176_v63 = vld [vmem:[#allocation8] sm:$0xff] }
  0x2c   :  { %142 = vmatpush.msra.mxu0 %v104_v30  ;;  %162 = vmatpush.msra.mxu1 %v105_v31  ;;  %v194_v60 = vld [vmem:[#allocation8 + $0x90] sm:$0xff]  ;;  %v193_v62 = vld [vmem:[#allocation8 + $0x88] sm:$0xff]  ;;  %v192_v0 = vld [vmem:[#allocation8 + $0x80] sm:$0xff] }
  0x2d   :  { %237 = vmatpush.msra.mxu3 %v200_v41  ;;  %218 = vmatpush.msra.mxu2 %v183_v44  ;;  %v126_v1 = vld [vmem:[#allocation7] ss:$8 sm:$0x3]  ;;  %v280_v12 = vld [vmem:[#allocation10] ss:$0 sm:$0xff] }
  0x2e   :  { %143 = vmatpush.msra.mxu0 %v102_v34  ;;  %163 = vmatpush.msra.mxu1 %v103_v35  ;;  %v128_v2 = vperm.slane %v126_v1, 0  ;;  %v129_v3 = vperm.slane %v126_v1, 1 }
  0x2f   :  { %238 = vmatpush.msra.mxu3 %v199_v45  ;;  %219 = vmatpush.msra.mxu2 %v182_v48 }
  0x30   :  { %144 = vmatpush.msra.mxu0 %v100_v38  ;;  %164 = vmatpush.msra.mxu1 %v101_v39 }
  0x31   :  { %239 = vmatpush.msra.mxu3 %v198_v49  ;;  %220 = vmatpush.msra.mxu2 %v181_v53 }
  0x32   :  { %145 = vmatpush.msra.mxu0 %v98_v42  ;;  %165 = vmatpush.msra.mxu1 %v99_v43 }
  0x33   :  { %240 = vmatpush.msra.mxu3 %v197_v54  ;;  %221 = vmatpush.msra.mxu2 %v180_v55 }
  0x34   :  { %146 = vmatpush.msra.mxu0 %v96_v46  ;;  %166 = vmatpush.msra.mxu1 %v97_v47 }
  0x35   :  { %241 = vmatpush.msra.mxu3 %v196_v56  ;;  %222 = vmatpush.msra.mxu2 %v179_v57 }
  0x36   :  { %147 = vmatpush.msra.mxu0 %v94_v50  ;;  %167 = vmatpush.msra.mxu1 %v95_v51 }
  0x37   :  { %148 = vmatmul.f32.vlgmr.msra.gmra.mxu0 %v93_v52  ;;  %168 = vmatmul.f32.vlgmr.msra.gmra.mxu1 %v93_v52 }
  0x38   :  { %242 = vmatpush.msra.mxu3 %v195_v58  ;;  %223 = vmatpush.msra.mxu2 %v178_v59 }
  0x3a   :  { %243 = vmatpush.msra.mxu3 %v194_v60  ;;  %224 = vmatpush.msra.mxu2 %v177_v61 }
  0x3c   :  { %244 = vmatpush.msra.mxu3 %v193_v62  ;;  %225 = vmatpush.msra.mxu2 %v176_v63 }
  0x3e   :  { %245 = vmatpush.msra.mxu3 %v192_v0 }
  0xb4   :  { %v149_v4 = vpop.f32.mrf.mxu0  ;;  %v169_v5 = vpop.f32.mrf.mxu1 }
  0xb5   :  { %v150_v6 = vadd.f32 %v149_v4, %v128_v2  ;;  %v170_v7 = vadd.f32 %v169_v5, %v129_v3 }
  0xb7   :  { %v172_v8 = vmul.f32 0.1, %v150_v6  ;;  %v173_v9 = vmul.f32 0.1, %v170_v7 }
  0xb9   :  { %v174_v10 = vmax.f32 %v150_v6, %v172_v8  ;;  %v175_v11 = vmax.f32 %v170_v7, %v173_v9 }
  0xbb   :  { %226 = vmatmul.f32.vlgmr.msra.gmra.mxu2 %v174_v10  ;;  %246 = vmatmul.f32.vlgmr.msra.gmra.mxu3 %v175_v11 }
 0x13e   :  { %v227_v13 = vpop.f32.mrf.mxu2  ;;  %v247_v15 = vpop.f32.mrf.mxu3 }
 0x13f   :  { %v228_v14 = vadd.f32 %v280_v12, %v227_v13 }
 0x141   :  { %v248_v16 = vadd.f32 %v247_v15, %v228_v14 }
 0x143   :  { %250 = vst [vmem:[#allocation11] sm:$0xf] %v248_v16 }
 0x144   :  { %261 = dma.vmem_to_hbm [thread:$0]  %s257_s4, 64, %s259_s21, [#allocation4]  }
 0x145   :  { %431 = dma.done.wait [#allocation4], 64  }
 0x146   :  { %432 = vsyncadd [#allocation4], 4294967232 }
 0x147   :  { %266 = vsyncpa [#allocation3], 1 }
 0x148   :  { %267 = vsyncpa [#allocation6], 1 }
 0x149   :  { %268 = vsyncpa [#allocation9], 1 }
 0x14a   :  { %269 = vsyncpa [#allocation4], 1 }

</bundles_post_ra>
